<compile_context>
chip_gen: v5e
topology: v5e:2x2
jax: 0.10.0
libtpu: 0.0.40
codegen_flags: <defaults>
</compile_context>

<pallas_src>
import functools

import jax
import jax.numpy as jnp
from jax.experimental import pallas as pl
from jax.experimental.pallas import tpu as pltpu

HIDDEN = 25          # logical hidden width (matches torch module)
HPAD = 32            # padded hidden width (sublane aligned)
IN_F = 2
OUT_F = 1
MAX_TB = 4096        # lane-tile cap; tiny working set, safe on v7x 64 MiB VMEM


def _round_up(x, m):
    return ((x + m - 1) // m) * m


def _mlp_kernel(z_ref, w1_ref, b1_ref, w2_ref, b2_ref, w3_ref, b3_ref, o_ref):
    z = z_ref[...]                       # [2, TB]
    w1 = w1_ref[...]                     # [HPAD, 2]

    # Layer 1: K=2 contraction -> VPU broadcast FMA (skip the MXU entirely).
    h1 = w1[:, 0:1] * z[0:1, :] + w1[:, 1:2] * z[1:2, :] + b1_ref[...]
    h1 = jnp.maximum(h1, 0.0)            # [HPAD, TB]

    # Layer 2: [HPAD, HPAD] @ [HPAD, TB] on the MXU, bias fused.
    h2 = jnp.dot(w2_ref[...], h1, preferred_element_type=jnp.float32) + b2_ref[...]
    h2 = jnp.maximum(h2, 0.0)            # [HPAD, TB]

    # Layer 3: [1, HPAD] @ [HPAD, TB] -> lane-dense [1, TB] output.
    out = jnp.dot(w3_ref[...], h2, preferred_element_type=jnp.float32) + b3_ref[...]
    o_ref[...] = out.astype(o_ref.dtype)


def discriminator_forward(z, padded_params):
    """z: [B, 2] float32 -> [B, 1] float32. padded_params from pad_params()."""
    w1, b1, w2, b2, w3, b3 = padded_params
    B = z.shape[0]

    # Lane tile: multiple of 128, capped so the double-buffered working set
    # stays far under the scoped-VMEM default on every chip generation.
    TB = min(MAX_TB, _round_up(B, 128))
    num_tiles = pl.cdiv(B, TB)
    B_pad = num_tiles * TB

    # Transpose/pad in the wrapper so the kernel only sees lane-dense tiles.
    z_t = jnp.zeros((IN_F, B_pad), jnp.float32).at[:, :B].set(z.T)

    const = lambda a: pl.BlockSpec(a.shape, lambda i: (0, 0))  # VMEM-resident

    flops = 2 * B_pad * (IN_F * HPAD + HPAD * HPAD + HPAD * OUT_F)
    bytes_accessed = 4 * (B_pad * (IN_F + OUT_F)
                          + HPAD * IN_F + HPAD + HPAD * HPAD + HPAD + HPAD + 1)

    out_t = pl.pallas_call(
        _mlp_kernel,
        out_shape=jax.ShapeDtypeStruct((OUT_F, B_pad), jnp.float32),
        grid=(num_tiles,),
        in_specs=[
            pl.BlockSpec((IN_F, TB), lambda i: (0, i)),   # z tile (pipelined)
            const(w1), const(b1), const(w2), const(b2), const(w3), const(b3),
        ],
        out_specs=pl.BlockSpec((OUT_F, TB), lambda i: (0, i)),
        compiler_params=pltpu.CompilerParams(
            dimension_semantics=("parallel",)),
        cost_estimate=pl.CostEstimate(
            flops=flops, transcendentals=0, bytes_accessed=bytes_accessed),
    )(z_t, w1, b1, w2, b2, w3, b3)

    return out_t[:, :B].T                                   # [B, 1]


def init_params(key):
    """Deterministic init mimicking torch.nn.Linear default (uniform ±1/sqrt(fan_in)).
    Logical shapes: weights [out, in], biases [out]."""
    dims = [(IN_F, HIDDEN), (HIDDEN, HIDDEN), (HIDDEN, OUT_F)]
    params = []
    for fan_in, fan_out in dims:
        key, kw, kb = jax.random.split(key, 3)
        bound = 1.0 / jnp.sqrt(fan_in)
        w = jax.random.uniform(kw, (fan_out, fan_in), jnp.float32, -bound, bound)
        b = jax.random.uniform(kb, (fan_out,), jnp.float32, -bound, bound)
        params += [w, b]
    return tuple(params)


def pad_params(params):
    """Zero-pad hidden dim 25 -> 32; biases become [out, 1] columns."""
    w1, b1, w2, b2, w3, b3 = params
    w1p = jnp.zeros((HPAD, IN_F), jnp.float32).at[:HIDDEN, :].set(w1)
    b1p = jnp.zeros((HPAD, 1), jnp.float32).at[:HIDDEN, 0].set(b1)
    w2p = jnp.zeros((HPAD, HPAD), jnp.float32).at[:HIDDEN, :HIDDEN].set(w2)
    b2p = jnp.zeros((HPAD, 1), jnp.float32).at[:HIDDEN, 0].set(b2)
    w3p = jnp.zeros((OUT_F, HPAD), jnp.float32).at[:, :HIDDEN].set(w3)
    b3p = b3.reshape(OUT_F, 1)
    return (w1p, b1p, w2p, b2p, w3p, b3p)


def reference_forward(z, params):
    w1, b1, w2, b2, w3, b3 = params
    h1 = jnp.maximum(z @ w1.T + b1, 0.0)
    h2 = jnp.maximum(h1 @ w2.T + b2, 0.0)
    return h2 @ w3.T + b3


if __name__ == "__main__":
    key = jax.random.PRNGKey(0)
    k_param, k_in = jax.random.split(key)
    params = init_params(k_param)
    padded = pad_params(params)

    B = 8
    z = jax.random.normal(k_in, (B, IN_F), jnp.float32)

    out = discriminator_forward(z, padded)
    jax.block_until_ready(out)

    ref = reference_forward(z, params)
    assert out.shape == (B, OUT_F), out.shape
    assert jnp.allclose(out, ref, atol=1e-5, rtol=1e-5), (out, ref)
    print("KERNEL_OK")
</pallas_src>

<mosaic_0001>
module attributes {stable_mosaic.version = 11 : i64} {
  func.func @_mlp_kernel(%arg0: i32, %arg1: memref<2x128xf32, #tpu.memory_space<vmem>>, %arg2: memref<32x2xf32, #tpu.memory_space<vmem>>, %arg3: memref<32x1xf32, #tpu.memory_space<vmem>>, %arg4: memref<32x32xf32, #tpu.memory_space<vmem>>, %arg5: memref<32x1xf32, #tpu.memory_space<vmem>>, %arg6: memref<1x32xf32, #tpu.memory_space<vmem>>, %arg7: memref<1x1xf32, #tpu.memory_space<vmem>>, %arg8: memref<1x128xf32, #tpu.memory_space<vmem>>) attributes {dimension_semantics = [#tpu.dimension_semantics<parallel>], iteration_bounds = array<i64: 1>, scalar_prefetch = 0 : i64, scratch_operands = 0 : i64, tpu.core_type = #tpu.core_type<tc>, window_params = [{transform_indices = @transform_0, window_bounds = array<i64: 2, 128>}, {pipeline_mode = #tpu.pipeline_mode<synchronous>, transform_indices = @transform_1, window_bounds = array<i64: 32, 2>}, {pipeline_mode = #tpu.pipeline_mode<synchronous>, transform_indices = @transform_2, window_bounds = array<i64: 32, 1>}, {pipeline_mode = #tpu.pipeline_mode<synchronous>, transform_indices = @transform_3, window_bounds = array<i64: 32, 32>}, {pipeline_mode = #tpu.pipeline_mode<synchronous>, transform_indices = @transform_4, window_bounds = array<i64: 32, 1>}, {pipeline_mode = #tpu.pipeline_mode<synchronous>, transform_indices = @transform_5, window_bounds = array<i64: 1, 32>}, {pipeline_mode = #tpu.pipeline_mode<synchronous>, transform_indices = @transform_6, window_bounds = array<i64: 1, 1>}, {transform_indices = @transform_7, window_bounds = array<i64: 1, 128>}]} {
    %c0 = arith.constant 0 : index
    %c0_0 = arith.constant 0 : index
    %0 = vector.load %arg1[%c0, %c0_0] : memref<2x128xf32, #tpu.memory_space<vmem>>, vector<2x128xf32>
    %c0_1 = arith.constant 0 : index
    %c0_2 = arith.constant 0 : index
    %1 = vector.load %arg2[%c0_1, %c0_2] : memref<32x2xf32, #tpu.memory_space<vmem>>, vector<32x2xf32>
    %2 = vector.extract_strided_slice %1 {offsets = [0, 0], sizes = [32, 1], strides = [1, 1]} : vector<32x2xf32> to vector<32x1xf32>
    %3 = vector.extract_strided_slice %0 {offsets = [0, 0], sizes = [1, 128], strides = [1, 1]} : vector<2x128xf32> to vector<1x128xf32>
    %4 = vector.broadcast %2 : vector<32x1xf32> to vector<32x128xf32>
    %5 = vector.broadcast %3 : vector<1x128xf32> to vector<32x128xf32>
    %6 = arith.mulf %4, %5 : vector<32x128xf32>
    %7 = vector.extract_strided_slice %1 {offsets = [0, 1], sizes = [32, 1], strides = [1, 1]} : vector<32x2xf32> to vector<32x1xf32>
    %8 = vector.extract_strided_slice %0 {offsets = [1, 0], sizes = [1, 128], strides = [1, 1]} : vector<2x128xf32> to vector<1x128xf32>
    %9 = vector.broadcast %7 : vector<32x1xf32> to vector<32x128xf32>
    %10 = vector.broadcast %8 : vector<1x128xf32> to vector<32x128xf32>
    %11 = arith.mulf %9, %10 : vector<32x128xf32>
    %12 = arith.addf %6, %11 : vector<32x128xf32>
    %c0_3 = arith.constant 0 : index
    %c0_4 = arith.constant 0 : index
    %13 = vector.load %arg3[%c0_3, %c0_4] : memref<32x1xf32, #tpu.memory_space<vmem>>, vector<32x1xf32>
    %14 = vector.broadcast %13 : vector<32x1xf32> to vector<32x128xf32>
    %15 = arith.addf %12, %14 : vector<32x128xf32>
    %cst = arith.constant 0.000000e+00 : f32
    %16 = vector.broadcast %cst : f32 to vector<32x128xf32>
    %17 = arith.maximumf %15, %16 : vector<32x128xf32>
    %c0_5 = arith.constant 0 : index
    %c0_6 = arith.constant 0 : index
    %18 = vector.load %arg4[%c0_5, %c0_6] : memref<32x32xf32, #tpu.memory_space<vmem>>, vector<32x32xf32>
    %cst_7 = arith.constant dense<0.000000e+00> : vector<32x128xf32>
    %19 = tpu.matmul %18, %17, %cst_7 {dimension_numbers = #tpu.dot_dimension_numbers<[1], [0], [0], [1], [0, 0, 1, 1], [], []>} : vector<32x32xf32>, vector<32x128xf32>, vector<32x128xf32> -> vector<32x128xf32>
    %c0_8 = arith.constant 0 : index
    %c0_9 = arith.constant 0 : index
    %20 = vector.load %arg5[%c0_8, %c0_9] : memref<32x1xf32, #tpu.memory_space<vmem>>, vector<32x1xf32>
    %21 = vector.broadcast %20 : vector<32x1xf32> to vector<32x128xf32>
    %22 = arith.addf %19, %21 : vector<32x128xf32>
    %cst_10 = arith.constant 0.000000e+00 : f32
    %23 = vector.broadcast %cst_10 : f32 to vector<32x128xf32>
    %24 = arith.maximumf %22, %23 : vector<32x128xf32>
    %c0_11 = arith.constant 0 : index
    %c0_12 = arith.constant 0 : index
    %25 = vector.load %arg6[%c0_11, %c0_12] : memref<1x32xf32, #tpu.memory_space<vmem>>, vector<1x32xf32>
    %cst_13 = arith.constant dense<0.000000e+00> : vector<1x128xf32>
    %26 = tpu.matmul %25, %24, %cst_13 {dimension_numbers = #tpu.dot_dimension_numbers<[1], [0], [0], [1], [0, 0, 1, 1], [], []>} : vector<1x32xf32>, vector<32x128xf32>, vector<1x128xf32> -> vector<1x128xf32>
    %c0_14 = arith.constant 0 : index
    %c0_15 = arith.constant 0 : index
    %27 = vector.load %arg7[%c0_14, %c0_15] : memref<1x1xf32, #tpu.memory_space<vmem>>, vector<1x1xf32>
    %28 = vector.broadcast %27 : vector<1x1xf32> to vector<1x128xf32>
    %29 = arith.addf %26, %28 : vector<1x128xf32>
    %c0_16 = arith.constant 0 : index
    %c0_17 = arith.constant 0 : index
    %30 = vector.load %arg8[%c0_16, %c0_17] : memref<1x128xf32, #tpu.memory_space<vmem>>, vector<1x128xf32>
    tpu.vector_store %arg8[%c0_16, %c0_17], %29 {strides = array<i32>} : memref<1x128xf32, #tpu.memory_space<vmem>>, vector<1x128xf32>,
    return
  }
  func.func @transform_0(%arg0: i32) -> (i32, i32) {
    %c0_i32 = arith.constant 0 : i32
    %c0_i32_0 = arith.constant 0 : i32
    return %c0_i32, %arg0 : i32, i32
  }
  func.func @transform_1(%arg0: i32) -> (i32, i32) {
    %c0_i32 = arith.constant 0 : i32
    %c0_i32_0 = arith.constant 0 : i32
    %c0_i32_1 = arith.constant 0 : i32
    return %c0_i32, %c0_i32_0 : i32, i32
  }
  func.func @transform_2(%arg0: i32) -> (i32, i32) {
    %c0_i32 = arith.constant 0 : i32
    %c0_i32_0 = arith.constant 0 : i32
    %c0_i32_1 = arith.constant 0 : i32
    return %c0_i32, %c0_i32_0 : i32, i32
  }
  func.func @transform_3(%arg0: i32) -> (i32, i32) {
    %c0_i32 = arith.constant 0 : i32
    %c0_i32_0 = arith.constant 0 : i32
    %c0_i32_1 = arith.constant 0 : i32
    return %c0_i32, %c0_i32_0 : i32, i32
  }
  func.func @transform_4(%arg0: i32) -> (i32, i32) {
    %c0_i32 = arith.constant 0 : i32
    %c0_i32_0 = arith.constant 0 : i32
    %c0_i32_1 = arith.constant 0 : i32
    return %c0_i32, %c0_i32_0 : i32, i32
  }
  func.func @transform_5(%arg0: i32) -> (i32, i32) {
    %c0_i32 = arith.constant 0 : i32
    %c0_i32_0 = arith.constant 0 : i32
    %c0_i32_1 = arith.constant 0 : i32
    return %c0_i32, %c0_i32_0 : i32, i32
  }
  func.func @transform_6(%arg0: i32) -> (i32, i32) {
    %c0_i32 = arith.constant 0 : i32
    %c0_i32_0 = arith.constant 0 : i32
    %c0_i32_1 = arith.constant 0 : i32
    return %c0_i32, %c0_i32_0 : i32, i32
  }
  func.func @transform_7(%arg0: i32) -> (i32, i32) {
    %c0_i32 = arith.constant 0 : i32
    %c0_i32_0 = arith.constant 0 : i32
    return %c0_i32, %arg0 : i32, i32
  }
}

</mosaic_0001>

<bundles_post_ra>
// kernel: tpu_custom_call.1
= control target key start
LH: loop header
LB: loop body
LE: loop exit
PB: predicated region body
PF: predicated region fallthrough
CT: control target
= control target key end

     0   :  { %s397_s0 = inlined_call_operand.vmem [shape: f32[2,128], index: 0, kind: input, shape index: {}]   ;;  %s398_s1 = inlined_call_operand.vmem [shape: f32[32,2], index: 1, kind: input, shape index: {}]   ;;  %s399_s2 = inlined_call_operand.vmem [shape: f32[32,1], index: 2, kind: input, shape index: {}]   ;;  %s400_s3 = inlined_call_operand.vmem [shape: f32[32,32], index: 3, kind: input, shape index: {}]   ;;  %s401_s4 = inlined_call_operand.vmem [shape: f32[32,1], index: 4, kind: input, shape index: {}]   ;;  %s402_s5 = inlined_call_operand.vmem [shape: f32[1,32], index: 5, kind: input, shape index: {}]   ;;  %s403_s6 = inlined_call_operand.<no memory space> [shape: f32[1,1], index: 6, kind: input, shape index: {}]   ;;  %s404_s7 = inlined_call_operand.hbm [shape: f32[1,128], index: 7, kind: output, shape index: {}]  }
   0x1   :  { %v12_v0 = vstv %s403_s6 }
   0x2   :  { %13 = vst [vmem:[#allocation2] sm:$0x1] %v12_v0 }
   0x3   :  { %v33_v1 = vld [vmem:[%s398_s1 + $0x18] sm:$0xff]  ;;  %v32_v2 = vld [vmem:[%s398_s1 + $0x10] sm:$0xff]  ;;  %v289_v3 = vmov 0   ;;  %v31_v4 = vld [vmem:[%s398_s1 + $0x8] sm:$0xff] }
   0x4   :  { %256 = vset.pattern.permute.xlu1 %v289_v3  ;;  %254 = vset.pattern.permute.xlu0 %v289_v3 }
   0x5   :  { %51 = vperm.xlu0 %254, %v33_v1   ;;  %46 = vperm.xlu1 %256, %v32_v2  }
   0x6   :  { %258 = vset.pattern.permute.xlu2 %v289_v3 }
   0x7   :  { %14 = vsyncpa [#allocation4], 0  ;;  %41 = vperm.xlu2 %258, %v31_v4   ;;  %v290_v5 = vmov 1   ;;  %v30_v6 = vld [vmem:[%s398_s1] sm:$0xff]  ;;  %v87_v7 = vld [vmem:[%s399_s2 + $0x18] sm:$0xff]  ;;  %vm144_vm0 = vcmask 261120  }
   0x8   :  { %v86_v8 = vld [vmem:[%s399_s2 + $0x10] sm:$0xff]  ;;  %v84_v9 = vld [vmem:[%s399_s2] sm:$0xff]  ;;  %v85_v10 = vld [vmem:[%s399_s2 + $0x8] sm:$0xff]  ;;  %s291_s9 = smov [#allocation3]   ;;  %s229_s13 = sshll.u32 %s404_s7, 4  ;;  %s230_s13 = int_to_ptr.hbm [resolvable:$true] %s229_s13 }
   0x9   :  { %v123_v11 = vld [vmem:[%s401_s4 + $0x18] sm:$0xff]  ;;  %v191_v12 = vld [vmem:[#allocation2] sm:$0x1]  ;;  %v122_v13 = vld [vmem:[%s401_s4 + $0x10] sm:$0xff]  ;;  %s227_s10 = sshll.u32 %s291_s9, 4  ;;  %s228_s10 = int_to_ptr.vmem [resolvable:$true] %s227_s10 }
   0xa   :  { %v121_v14 = vld [vmem:[%s401_s4 + $0x8] sm:$0xff]  ;;  %v120_v15 = vld [vmem:[%s401_s4] sm:$0xff]  ;;  %v118_v53 = vld [vmem:[%s400_s3 + $0x10] sm:$0xff] }
   0xb   :  { %v29_v22 = vld [vmem:[%s397_s0] sm:$0x3]  ;;  %v117_v52 = vld [vmem:[%s400_s3 + $0x8] sm:$0xff]  ;;  %v119_v54 = vld [vmem:[%s400_s3 + $0x18] sm:$0xff] }
   0xc   :  { %v75_v23 = vperm.slane %v29_v22, 1  ;;  %v54_v24 = vperm.slane %v29_v22, 0  ;;  %v116_v51 = vld [vmem:[%s400_s3] sm:$0xff] }
   0xd   :  { %255 = vset.pattern.permute.xlu0 %v290_v5  ;;  %257 = vset.pattern.permute.xlu1 %v290_v5 }
   0xe   :  { %72 = vperm.xlu0 %255, %v33_v1   ;;  %68 = vperm.xlu1 %257, %v32_v2  }
   0xf   :  { %259 = vset.pattern.permute.xlu2 %v290_v5 }
  0x10   :  { %64 = vperm.xlu2 %259, %v31_v4  }
  0x16   :  { %260 = vset.pattern.permute.xlu1 %v289_v3  ;;  %60 = vperm.xlu0 %255, %v30_v6  }
  0x17   :  { %105 = vperm.xlu1 %260, %v87_v7   ;;  %v190_v7 = vld [vmem:[%s402_s5] sm:$0x1] }
  0x18   :  { %261 = vset.pattern.permute.xlu2 %v289_v3 }
  0x19   :  { %36 = vperm.xlu2 %261, %v30_v6  }
  0x1e   :  { %262 = vset.pattern.permute.xlu0 %v289_v3 }
  0x1f   :  { %100 = vperm.xlu1 %260, %v86_v8   ;;  %90 = vperm.xlu0 %262, %v84_v9  }
  0x21   :  { %95 = vperm.xlu2 %261, %v85_v10  }
  0x27   :  { %141 = vperm.xlu1 %260, %v123_v11   ;;  %194 = vperm.xlu0 %262, %v191_v12  }
  0x29   :  { %136 = vperm.xlu2 %261, %v122_v13  }
  0x2f   :  { %131 = vperm.xlu1 %260, %v121_v14  }
  0x31   :  { %126 = vperm.xlu2 %261, %v120_v15  }
  0x61   :  { %v42_v16 = vpop.permute.xlu2 %41 }
  0x62   :  { %v56_v30 = vmul.f32 %v54_v24, %v42_v16 }
  0x6a   :  { %v65_v19 = vpop.permute.xlu2 %64 }
  0x6b   :  { %v77_v31 = vmul.f32 %v75_v23, %v65_v19 }
  0x6d   :  { %v81_v36 = vadd.f32 %v77_v31, %v56_v30 }
  0x73   :  { %v37_v26 = vpop.permute.xlu2 %36 }
  0x74   :  { %v55_v37 = vmul.f32 %v54_v24, %v37_v26 }
  0x77   :  { %v47_v17 = vpop.permute.xlu1 %46  ;;  %v52_v18 = vpop.permute.xlu0 %51 }
  0x78   :  { %v58_v27 = vmul.f32 %v54_v24, %v52_v18  ;;  %v57_v38 = vmul.f32 %v54_v24, %v47_v17 }
  0x7b   :  { %v96_v40 = vpop.permute.xlu2 %95 }
  0x7c   :  { %v109_v44 = vadd.f32 %v96_v40, %v81_v36 }
  0x7e   :  { %v113_v49 = vmax.f32 %v109_v44, 0.0 }
  0x80   :  { %v73_v20 = vpop.permute.xlu0 %72  ;;  %v69_v21 = vpop.permute.xlu1 %68 }
  0x81   :  { %v79_v25 = vmul.f32 %v75_v23, %v73_v20  ;;  %v78_v34 = vmul.f32 %v75_v23, %v69_v21 }
  0x83   :  { %v83_v29 = vadd.f32 %v79_v25, %v58_v27  ;;  %v82_v41 = vadd.f32 %v78_v34, %v57_v38  ;;  %v137_v57 = vpop.permute.xlu2 %136 }
  0x88   :  { %v61_v28 = vpop.permute.xlu0 %60 }
  0x89   :  { %v106_v32 = vpop.permute.xlu1 %105  ;;  %v76_v39 = vmul.f32 %v75_v23, %v61_v28 }
  0x8a   :  { %v111_v33 = vadd.f32 %v106_v32, %v83_v29 }
  0x8b   :  { %v80_v46 = vadd.f32 %v76_v39, %v55_v37  ;;  %v127_v2 = vpop.permute.xlu2 %126 }
  0x8c   :  { %v115_v35 = vmax.f32 %v111_v33, 0.0 }
  0x8e   :  { %169 = vmatpush.msra.mxu0 %v115_v35  ;;  %243 = vmatpush.msra.mxu2 %v115_v35 }
  0x8f   :  { %244 = vmatpush.msra.mxu3 %v115_v35 }
  0x91   :  { %v101_v42 = vpop.permute.xlu1 %100  ;;  %v91_v43 = vpop.permute.xlu0 %90 }
  0x92   :  { %v110_v45 = vadd.f32 %v101_v42, %v82_v41  ;;  %v108_v48 = vadd.f32 %v91_v43, %v80_v46 }
  0x94   :  { %v114_v47 = vmax.f32 %v110_v45, 0.0  ;;  %v112_v50 = vmax.f32 %v108_v48, 0.0 }
  0x96   :  { %170 = vmatpush.msra.mxu0 %v114_v47  ;;  %245 = vmatpush.msra.mxu2 %v114_v47 }
  0x97   :  { %246 = vmatpush.msra.mxu3 %v114_v47 }
  0x98   :  { %171 = vmatpush.msra.mxu0 %v113_v49  ;;  %247 = vmatpush.msra.mxu2 %v113_v49 }
  0x99   :  { %248 = vmatpush.msra.mxu3 %v113_v49  ;;  %v142_v55 = vpop.permute.xlu1 %141  ;;  %v195_v8 = vpop.permute.xlu0 %194 }
  0x9a   :  { %172 = vmatpush.msra.mxu0 %v112_v50  ;;  %249 = vmatpush.msra.mxu2 %v112_v50  ;;  %v197_v9 = vperm.slane %v195_v8, 0 }
  0x9b   :  { %250 = vmatpush.msra.mxu3 %v112_v50  ;;  %238 = vmatmul.msk.f32.vlgmr.msra.gmra.mxu0 %vm144_vm0, %v116_v51 }
  0x9c   :  { %239 = vmatmul.msk.f32.vlgmr.msra.gmra.mxu2 %vm144_vm0, %v117_v52  ;;  %240 = vmatmul.msk.f32.vlgmr.msra.gmra.mxu3 %vm144_vm0, %v118_v53 }
  0xa1   :  { %v132_v62 = vpop.permute.xlu1 %131 }
  0xa4   :  { %241 = vmatmul.msk.f32.gmra.mxu3 %vm144_vm0, %v119_v54 }
 0x118   :  { %v174_v63 = vpop.f32.mrf.mxu0 }
 0x119   :  { %v175_v3 = vadd.f32 %v174_v63, %v127_v2 }
 0x11b   :  { %v186_v6 = vmax.f32 %v175_v3, 0.0 }
 0x11f   :  { %v180_v56 = vpop.f32.mrf.mxu3  ;;  %v177_v58 = vpop.f32.mrf.mxu2 }
 0x120   :  { %v181_v60 = vadd.f32 %v180_v56, %v137_v57  ;;  %v178_v0 = vadd.f32 %v177_v58, %v132_v62 }
 0x122   :  { %v188_v4 = vmax.f32 %v181_v60, 0.0  ;;  %v187_v5 = vmax.f32 %v178_v0, 0.0 }
 0x127   :  { %v183_v59 = vpop.f32.mrf.mxu3 }
 0x128   :  { %v184_v61 = vadd.f32 %v183_v59, %v142_v55 }
 0x12a   :  { %v189_v1 = vmax.f32 %v184_v61, 0.0 }
 0x12c   :  { %213 = vmatpush.msra.mxu1 %v189_v1 }
 0x12e   :  { %214 = vmatpush.msra.mxu1 %v188_v4 }
 0x130   :  { %215 = vmatpush.msra.mxu1 %v187_v5 }
 0x132   :  { %216 = vmatpush.msra.mxu1 %v186_v6 }
 0x133   :  { %242 = vmatmul.msk.f32.vlgmr.msra.gmra.mxu1 %vm144_vm0, %v190_v7 }
 0x1b0   :  { %v218_v10 = vpop.f32.mrf.mxu1 }
 0x1b1   :  { %v219_v11 = vadd.f32 %v218_v10, %v197_v9 }
 0x1b3   :  { %221 = vst [vmem:[#allocation3] sm:$0x1] %v219_v11 }
 0x1b4   :  { %232 = dma.vmem_to_hbm [thread:$0]  %s228_s10, 16, %s230_s13, [#allocation4]  }
 0x1b5   :  { %287 = dma.done.wait [#allocation4], 16  }
 0x1b6   :  { %288 = vsyncadd [#allocation4], 4294967280 }
 0x1b7   :  { %237 = vsyncpa [#allocation4], 1 }

</bundles_post_ra>
